<compile_context>
chip_gen: v7x
topology: tpu7x:2x2x1
jax: 0.10.0
libtpu: 0.0.40
codegen_flags: <defaults>
</compile_context>

<pallas_src>
import functools
import math

import jax
import jax.numpy as jnp
from jax import lax
from jax.experimental import pallas as pl
from jax.experimental.pallas import tpu as pltpu


# --------------------------------------------------------------------------
# helpers
# --------------------------------------------------------------------------
def _round_up(x, m):
    return ((x + m - 1) // m) * m


def _pad2d(a, rows, cols):
    return jnp.pad(a, ((0, rows - a.shape[0]), (0, cols - a.shape[1])))


def _nbytes(shape, dtype):
    return math.prod(shape) * jnp.dtype(dtype).itemsize


def _vmem_capacity_bytes():
    """Physical VMEM per TensorCore (chip-aware, conservative fallback)."""
    try:
        info = pltpu.get_tpu_info()
        cap = getattr(info, "vmem_capacity_bytes", None)
        if cap:
            return int(cap)
    except Exception:
        pass
    return 64 << 20  # v7x-safe default


def _vmem_limit_bytes(needed):
    # ~54 MiB on v7x, ~109 MiB on v5e/v6e - never above physical VMEM.
    cap = int(0.85 * _vmem_capacity_bytes())
    return int(min(max(needed + (4 << 20), 32 << 20), cap))


def _spec(block_shape, index_map, buffers=None):
    """BlockSpec with an optional explicit buffer count (graceful fallback
    if this JAX build has no BlockSpec pipeline_mode support)."""
    if buffers is not None and hasattr(pl, "Buffered"):
        try:
            return pl.BlockSpec(block_shape, index_map,
                                pipeline_mode=pl.Buffered(buffers))
        except TypeError:
            pass
    return pl.BlockSpec(block_shape, index_map)


def _choose_tk(n_pad, tk_max):
    """Largest multiple of 128 that divides n_pad and is <= tk_max."""
    best = 128
    m = n_pad // 128
    for d in range(1, min(m, max(1, tk_max // 128)) + 1):
        if m % d == 0:
            best = 128 * d
    return best


def _dequant(adj_q):
    # int8 values |q| <= 127 are exactly representable in bf16; the per-row
    # scale is applied later in the f32 epilogue.
    return adj_q.astype(jnp.int32).astype(jnp.float32).astype(jnp.bfloat16)


# --------------------------------------------------------------------------
# kernels
# --------------------------------------------------------------------------
def _transform1_kernel(x_ref, w1_ref, s1_ref):
    # s1_tile = x_tile @ W1   (GraphConvolution feature transform, layer 1)
    s1_ref[...] = jnp.dot(
        x_ref[...], w1_ref[...], preferred_element_type=jnp.float32
    ).astype(s1_ref.dtype)


def _agg1_relu_transform2_kernel(adj_ref, s1_ref, scale_ref, b1_ref, w2_ref,
                                 s2_ref, acc_ref):
    # K-blocked: acc += adj_q_tile @ s1_block ; epilogue: relu + transform 2.
    k = pl.program_id(1)

    @pl.when(k == 0)
    def _():
        acc_ref[...] = jnp.zeros_like(acc_ref)

    acc_ref[...] += jnp.dot(_dequant(adj_ref[...]), s1_ref[...],
                            preferred_element_type=jnp.float32)

    @pl.when(k == pl.num_programs(1) - 1)
    def _():
        h1 = jnp.maximum(acc_ref[...] * scale_ref[...] + b1_ref[...], 0.0)
        # F.dropout(..., training=self.training): eval mode -> identity.
        # TODO(synk): stochastic dropout via pltpu.prng_random_bits if a
        # training-mode forward is ever needed.
        s2_ref[...] = jnp.dot(
            h1.astype(w2_ref.dtype), w2_ref[...],
            preferred_element_type=jnp.float32
        ).astype(s2_ref.dtype)


def _agg2_logsoftmax_kernel(adj_ref, s2_ref, scale_ref, b2_ref, out_ref,
                            acc_ref, *, nclass):
    # K-blocked: acc += adj_q_tile @ s2_block ; epilogue: bias + log_softmax.
    k = pl.program_id(1)

    @pl.when(k == 0)
    def _():
        acc_ref[...] = jnp.zeros_like(acc_ref)

    acc_ref[...] += jnp.dot(_dequant(adj_ref[...]), s2_ref[...],
                            preferred_element_type=jnp.float32)

    @pl.when(k == pl.num_programs(1) - 1)
    def _():
        h2 = acc_ref[...] * scale_ref[...] + b2_ref[...]
        col = lax.broadcasted_iota(jnp.int32, h2.shape, 1)
        h2 = jnp.where(col < nclass, h2, -jnp.inf)
        m = jnp.max(h2, axis=1, keepdims=True)
        z = h2 - m
        out_ref[...] = z - jnp.log(jnp.sum(jnp.exp(z), axis=1, keepdims=True))


def _fused_kernel(x_ref, adj_ref, scale_ref, w1_ref, b1_ref, w2_ref, b2_ref,
                  out_ref, *, nclass):
    # Whole problem resident in VMEM: adj is read from HBM exactly once.
    adj = _dequant(adj_ref[...])
    s1 = jnp.dot(x_ref[...], w1_ref[...], preferred_element_type=jnp.float32)
    h1 = jnp.dot(adj, s1.astype(jnp.bfloat16),
                 preferred_element_type=jnp.float32)
    h1 = jnp.maximum(h1 * scale_ref[...] + b1_ref[...], 0.0)
    # dropout: identity in eval mode.
    s2 = jnp.dot(h1.astype(jnp.bfloat16), w2_ref[...],
                 preferred_element_type=jnp.float32)
    h2 = jnp.dot(adj, s2.astype(jnp.bfloat16),
                 preferred_element_type=jnp.float32)
    h2 = h2 * scale_ref[...] + b2_ref[...]
    col = lax.broadcasted_iota(jnp.int32, h2.shape, 1)
    h2 = jnp.where(col < nclass, h2, -jnp.inf)
    m = jnp.max(h2, axis=1, keepdims=True)
    z = h2 - m
    out_ref[...] = z - jnp.log(jnp.sum(jnp.exp(z), axis=1, keepdims=True))


# --------------------------------------------------------------------------
# paths
# --------------------------------------------------------------------------
def _forward_fused(xp, adjp, scalep, w1p, b1p, w2p, b2p, nclass, vmem_need):
    n_pad, f_pad = xp.shape
    h_pad = w1p.shape[1]
    c_pad = w2p.shape[1]
    io_bytes = int(sum(int(a.size) * a.dtype.itemsize
                       for a in (xp, adjp, scalep, w1p, b1p, w2p, b2p))
                   + n_pad * c_pad * 4)
    return pl.pallas_call(
        functools.partial(_fused_kernel, nclass=nclass),
        out_shape=jax.ShapeDtypeStruct((n_pad, c_pad), jnp.float32),
        compiler_params=pltpu.CompilerParams(
            vmem_limit_bytes=_vmem_limit_bytes(vmem_need)),
        cost_estimate=pl.CostEstimate(
            flops=2 * n_pad * (f_pad * h_pad + n_pad * h_pad
                               + h_pad * c_pad + n_pad * c_pad),
            transcendentals=2 * n_pad * c_pad,
            bytes_accessed=io_bytes),
    )(xp, adjp, scalep, w1p, b1p, w2p, b2p)


def _forward_general(xp, adjp, scalep, w1p, b1p, w2p, b2p,
                     nclass, tm, tk, use_buffered):
    n_pad, f_pad = xp.shape
    h_pad = w1p.shape[1]
    c_pad = w2p.shape[1]
    rows = n_pad // tm
    ks = n_pad // tk

    const_buf = 1 if use_buffered else None    # resident blocks: no 2x buffer
    adj_buf = 3 if use_buffered else None      # deeper buffering on adj stream

    # ---- call 1: s1 = x @ W1 --------------------------------------------
    need1 = (2 * _nbytes((tm, f_pad), jnp.bfloat16)
             + _nbytes((f_pad, h_pad), jnp.bfloat16)
             + 2 * _nbytes((tm, h_pad), jnp.bfloat16))
    s1 = pl.pallas_call(
        _transform1_kernel,
        out_shape=jax.ShapeDtypeStruct((n_pad, h_pad), jnp.bfloat16),
        grid=(rows,),
        in_specs=[
            _spec((tm, f_pad), lambda i: (i, 0)),
            _spec((f_pad, h_pad), lambda i: (0, 0), const_buf),
        ],
        out_specs=_spec((tm, h_pad), lambda i: (i, 0)),
        compiler_params=pltpu.CompilerParams(
            dimension_semantics=("parallel",),
            vmem_limit_bytes=_vmem_limit_bytes(need1)),
        cost_estimate=pl.CostEstimate(
            flops=2 * n_pad * f_pad * h_pad,
            transcendentals=0,
            bytes_accessed=(_nbytes((n_pad, f_pad), jnp.bfloat16)
                            + _nbytes((f_pad, h_pad), jnp.bfloat16)
                            + _nbytes((n_pad, h_pad), jnp.bfloat16))),
    )(xp, w1p)

    # ---- call 2: s2 = relu((adj @ s1) * scale + b1) @ W2  (K-blocked) ----
    need2 = (3 * _nbytes((tm, tk), jnp.int8)
             + 2 * _nbytes((tk, h_pad), jnp.bfloat16)
             + 2 * _nbytes((tm, 1), jnp.float32)
             + _nbytes((1, h_pad), jnp.float32)
             + _nbytes((h_pad, c_pad), jnp.bfloat16)
             + 2 * _nbytes((tm, c_pad), jnp.bfloat16)
             + _nbytes((tm, h_pad), jnp.float32))
    s1_reads = rows if ks > 1 else 1
    s2 = pl.pallas_call(
        _agg1_relu_transform2_kernel,
        out_shape=jax.ShapeDtypeStruct((n_pad, c_pad), jnp.bfloat16),
        grid=(rows, ks),
        in_specs=[
            _spec((tm, tk), lambda i, k: (i, k), adj_buf),
            _spec((tk, h_pad), lambda i, k: (k, 0)),
            _spec((tm, 1), lambda i, k: (i, 0)),
            _spec((1, h_pad), lambda i, k: (0, 0), const_buf),
            _spec((h_pad, c_pad), lambda i, k: (0, 0), const_buf),
        ],
        out_specs=_spec((tm, c_pad), lambda i, k: (i, 0)),
        scratch_shapes=[pltpu.VMEM((tm, h_pad), jnp.float32)],
        compiler_params=pltpu.CompilerParams(
            dimension_semantics=("parallel", "arbitrary"),
            vmem_limit_bytes=_vmem_limit_bytes(need2)),
        cost_estimate=pl.CostEstimate(
            flops=2 * n_pad * n_pad * h_pad + 2 * n_pad * h_pad * c_pad,
            transcendentals=0,
            bytes_accessed=(_nbytes((n_pad, n_pad), jnp.int8)
                            + s1_reads * _nbytes((n_pad, h_pad), jnp.bfloat16)
                            + _nbytes((n_pad, c_pad), jnp.bfloat16))),
    )(adjp, s1, scalep, b1p, w2p)

    # ---- call 3: out = log_softmax((adj @ s2) * scale + b2)  (K-blocked) --
    need3 = (3 * _nbytes((tm, tk), jnp.int8)
             + 2 * _nbytes((tk, c_pad), jnp.bfloat16)
             + 2 * _nbytes((tm, 1), jnp.float32)
             + _nbytes((1, c_pad), jnp.float32)
             + 2 * _nbytes((tm, c_pad), jnp.float32)
             + _nbytes((tm, c_pad), jnp.float32))
    s2_reads = rows if ks > 1 else 1
    out_pad = pl.pallas_call(
        functools.partial(_agg2_logsoftmax_kernel, nclass=nclass),
        out_shape=jax.ShapeDtypeStruct((n_pad, c_pad), jnp.float32),
        grid=(rows, ks),
        in_specs=[
            _spec((tm, tk), lambda i, k: (i, k), adj_buf),
            _spec((tk, c_pad), lambda i, k: (k, 0)),
            _spec((tm, 1), lambda i, k: (i, 0)),
            _spec((1, c_pad), lambda i, k: (0, 0), const_buf),
        ],
        out_specs=_spec((tm, c_pad), lambda i, k: (i, 0)),
        scratch_shapes=[pltpu.VMEM((tm, c_pad), jnp.float32)],
        compiler_params=pltpu.CompilerParams(
            dimension_semantics=("parallel", "arbitrary"),
            vmem_limit_bytes=_vmem_limit_bytes(need3)),
        cost_estimate=pl.CostEstimate(
            flops=2 * n_pad * n_pad * c_pad,
            transcendentals=2 * n_pad * c_pad,
            bytes_accessed=(_nbytes((n_pad, n_pad), jnp.int8)
                            + s2_reads * _nbytes((n_pad, c_pad), jnp.bfloat16)
                            + _nbytes((n_pad, c_pad), jnp.float32))),
    )(adjp, s2, scalep, b2p)

    return out_pad


# --------------------------------------------------------------------------
# wrapper
# --------------------------------------------------------------------------
def gcn_tkipf_forward(x, adj, w1, b1, w2, b2, *, tm=128, tk_max=2048,
                      force_general=False):
    assert tm % 128 == 0
    n, nfeat = x.shape
    nhid = w1.shape[1]
    nclass = w2.shape[1]

    n_pad = _round_up(n, tm)          # tm=128 -> minimal node padding
    f_pad = _round_up(nfeat, 128)
    h_pad = _round_up(nhid, 128)
    c_pad = _round_up(nclass, 128)
    tk = _choose_tk(n_pad, tk_max)

    x = x.astype(jnp.float32)
    adj = adj.astype(jnp.float32)

    # Per-row int8 quantization of adj (exact in bf16 after dequant; the row
    # scale is applied in the f32 epilogue).  Halves the dominant HBM stream.
    row_max = jnp.maximum(jnp.max(jnp.abs(adj), axis=1, keepdims=True), 1e-12)
    adj_q = jnp.clip(jnp.round(adj * (127.0 / row_max)), -127.0, 127.0)
    adjp = _pad2d(adj_q, n_pad, n_pad).astype(jnp.int8)
    scalep = _pad2d(row_max / 127.0, n_pad, 1).astype(jnp.float32)

    xp = _pad2d(x, n_pad, f_pad).astype(jnp.bfloat16)
    w1p = _pad2d(w1.astype(jnp.float32), f_pad, h_pad).astype(jnp.bfloat16)
    w2p = _pad2d(w2.astype(jnp.float32), h_pad, c_pad).astype(jnp.bfloat16)
    b1p = _pad2d(b1.reshape(1, -1).astype(jnp.float32), 1, h_pad)
    b2p = _pad2d(b2.reshape(1, -1).astype(jnp.float32), 1, c_pad)

    # Fused single-call path if everything (incl. f32 temporaries) fits a
    # chip-aware VMEM budget.
    fused_need = (_nbytes((n_pad, n_pad), jnp.int8)          # adj int8
                  + _nbytes((n_pad, n_pad), jnp.bfloat16)    # dequant temp
                  + _nbytes((n_pad, f_pad), jnp.bfloat16)
                  + _nbytes((f_pad, h_pad), jnp.bfloat16)
                  + _nbytes((h_pad, c_pad), jnp.bfloat16)
                  + 4 * n_pad * max(h_pad, c_pad) * 4        # f32 slabs
                  + _nbytes((n_pad, c_pad), jnp.float32))
    use_fused = (not force_general) and (
        fused_need <= int(0.45 * _vmem_capacity_bytes()))

    if use_fused:
        out_pad = _forward_fused(xp, adjp, scalep, w1p, b1p, w2p, b2p,
                                 nclass, fused_need)
    else:
        try:
            out_pad = _forward_general(xp, adjp, scalep, w1p, b1p, w2p, b2p,
                                       nclass, tm, tk, use_buffered=True)
        except Exception:
            # Fallback for JAX builds without BlockSpec pipeline_mode support.
            out_pad = _forward_general(xp, adjp, scalep, w1p, b1p, w2p, b2p,
                                       nclass, tm, tk, use_buffered=False)

    return out_pad[:n, :nclass]


# --------------------------------------------------------------------------
# parameter init (matches Kipf's GraphConvolution.reset_parameters)
# --------------------------------------------------------------------------
def init_gc_params(key, in_features, out_features):
    stdv = 1.0 / (out_features ** 0.5)
    kw, kb = jax.random.split(key)
    w = jax.random.uniform(kw, (in_features, out_features),
                           minval=-stdv, maxval=stdv, dtype=jnp.float32)
    b = jax.random.uniform(kb, (1, out_features),
                           minval=-stdv, maxval=stdv, dtype=jnp.float32)
    return w, b


def _reference(x, adj, w1, b1, w2, b2):
    h1 = jnp.maximum(adj @ (x @ w1) + b1.reshape(1, -1), 0.0)
    h2 = adj @ (h1 @ w2) + b2.reshape(1, -1)
    return jax.nn.log_softmax(h2, axis=1)


if __name__ == "__main__":
    key = jax.random.PRNGKey(0)

    def make_problem(k, n, nfeat, nhid, nclass, p):
        kx, ka, kw1, kw2 = jax.random.split(k, 4)
        x = jax.random.normal(kx, (n, nfeat), dtype=jnp.float32)
        a = (jax.random.uniform(ka, (n, n)) < p).astype(jnp.float32)
        a = jnp.clip(a + a.T + jnp.eye(n, dtype=jnp.float32), 0.0, 1.0)
        adj = a / jnp.sum(a, axis=1, keepdims=True)   # row-normalized
        w1, b1 = init_gc_params(kw1, nfeat, nhid)
        w2, b2 = init_gc_params(kw2, nhid, nclass)
        return x, adj, w1, b1, w2, b2

    key1, key2 = jax.random.split(key)

    # 1) Small graph (N=32, nfeat=16, nhid=32, nclass=8) -> fused one-call path.
    prob1 = make_problem(key1, 32, 16, 32, 8, 0.2)
    out1 = jax.block_until_ready(gcn_tkipf_forward(*prob1))
    ref1 = _reference(*prob1)
    assert out1.shape == (32, 8)
    err1 = float(jnp.max(jnp.abs(out1 - ref1)))
    assert err1 < 5e-2, f"fused path max abs err {err1}"

    # 2) Larger graph forced through the K-blocked 3-call path; tk_max=128
    #    gives a (3 row tiles x 3 K blocks) grid to exercise accumulation.
    prob2 = make_problem(key2, 300, 48, 64, 10, 0.1)
    out2 = jax.block_until_ready(
        gcn_tkipf_forward(*prob2, force_general=True, tk_max=128))
    ref2 = _reference(*prob2)
    assert out2.shape == (300, 10)
    err2 = float(jnp.max(jnp.abs(out2 - ref2)))
    assert err2 < 5e-2, f"general path max abs err {err2}"

    print("KERNEL_OK")
</pallas_src>

<mosaic_0001>
module attributes {stable_mosaic.version = 11 : i64} {
  func.func @_fused_kernel(%arg0: memref<128x128xbf16, #tpu.memory_space<vmem>>, %arg1: memref<128x128xi8, #tpu.memory_space<vmem>>, %arg2: memref<128x1xf32, #tpu.memory_space<vmem>>, %arg3: memref<128x128xbf16, #tpu.memory_space<vmem>>, %arg4: memref<1x128xf32, #tpu.memory_space<vmem>>, %arg5: memref<128x128xbf16, #tpu.memory_space<vmem>>, %arg6: memref<1x128xf32, #tpu.memory_space<vmem>>, %arg7: memref<128x128xf32, #tpu.memory_space<vmem>>) attributes {dimension_semantics = [], scalar_prefetch = 0 : i64, scratch_operands = 0 : i64, tpu.core_type = #tpu.core_type<tc>} {
    %c0 = arith.constant 0 : index
    %c0_0 = arith.constant 0 : index
    %0 = vector.load %arg1[%c0, %c0_0] : memref<128x128xi8, #tpu.memory_space<vmem>>, vector<128x128xi8>
    %1 = arith.extsi %0 : vector<128x128xi8> to vector<128x128xi32>
    %2 = arith.sitofp %1 : vector<128x128xi32> to vector<128x128xf32>
    %3 = arith.truncf %2 : vector<128x128xf32> to vector<128x128xbf16>
    %c0_1 = arith.constant 0 : index
    %c0_2 = arith.constant 0 : index
    %4 = vector.load %arg0[%c0_1, %c0_2] : memref<128x128xbf16, #tpu.memory_space<vmem>>, vector<128x128xbf16>
    %c0_3 = arith.constant 0 : index
    %c0_4 = arith.constant 0 : index
    %5 = vector.load %arg3[%c0_3, %c0_4] : memref<128x128xbf16, #tpu.memory_space<vmem>>, vector<128x128xbf16>
    %cst = arith.constant dense<0.000000e+00> : vector<128x128xf32>
    %6 = tpu.matmul %4, %5, %cst {dimension_numbers = #tpu.dot_dimension_numbers<[1], [0], [0], [1], [0, 0, 1, 1], [], []>} : vector<128x128xbf16>, vector<128x128xbf16>, vector<128x128xf32> -> vector<128x128xf32>
    %7 = arith.truncf %6 : vector<128x128xf32> to vector<128x128xbf16>
    %cst_5 = arith.constant dense<0.000000e+00> : vector<128x128xf32>
    %8 = tpu.matmul %3, %7, %cst_5 {dimension_numbers = #tpu.dot_dimension_numbers<[1], [0], [0], [1], [0, 0, 1, 1], [], []>} : vector<128x128xbf16>, vector<128x128xbf16>, vector<128x128xf32> -> vector<128x128xf32>
    %c0_6 = arith.constant 0 : index
    %c0_7 = arith.constant 0 : index
    %9 = vector.load %arg2[%c0_6, %c0_7] : memref<128x1xf32, #tpu.memory_space<vmem>>, vector<128x1xf32>
    %10 = vector.broadcast %9 : vector<128x1xf32> to vector<128x128xf32>
    %11 = arith.mulf %8, %10 : vector<128x128xf32>
    %c0_8 = arith.constant 0 : index
    %c0_9 = arith.constant 0 : index
    %12 = vector.load %arg4[%c0_8, %c0_9] : memref<1x128xf32, #tpu.memory_space<vmem>>, vector<1x128xf32>
    %13 = vector.broadcast %12 : vector<1x128xf32> to vector<128x128xf32>
    %14 = arith.addf %11, %13 : vector<128x128xf32>
    %cst_10 = arith.constant 0.000000e+00 : f32
    %15 = vector.broadcast %cst_10 : f32 to vector<128x128xf32>
    %16 = arith.maximumf %14, %15 : vector<128x128xf32>
    %17 = arith.truncf %16 : vector<128x128xf32> to vector<128x128xbf16>
    %c0_11 = arith.constant 0 : index
    %c0_12 = arith.constant 0 : index
    %18 = vector.load %arg5[%c0_11, %c0_12] : memref<128x128xbf16, #tpu.memory_space<vmem>>, vector<128x128xbf16>
    %cst_13 = arith.constant dense<0.000000e+00> : vector<128x128xf32>
    %19 = tpu.matmul %17, %18, %cst_13 {dimension_numbers = #tpu.dot_dimension_numbers<[1], [0], [0], [1], [0, 0, 1, 1], [], []>} : vector<128x128xbf16>, vector<128x128xbf16>, vector<128x128xf32> -> vector<128x128xf32>
    %20 = arith.truncf %19 : vector<128x128xf32> to vector<128x128xbf16>
    %cst_14 = arith.constant dense<0.000000e+00> : vector<128x128xf32>
    %21 = tpu.matmul %3, %20, %cst_14 {dimension_numbers = #tpu.dot_dimension_numbers<[1], [0], [0], [1], [0, 0, 1, 1], [], []>} : vector<128x128xbf16>, vector<128x128xbf16>, vector<128x128xf32> -> vector<128x128xf32>
    %c0_15 = arith.constant 0 : index
    %c0_16 = arith.constant 0 : index
    %22 = vector.load %arg2[%c0_15, %c0_16] : memref<128x1xf32, #tpu.memory_space<vmem>>, vector<128x1xf32>
    %23 = vector.broadcast %22 : vector<128x1xf32> to vector<128x128xf32>
    %24 = arith.mulf %21, %23 : vector<128x128xf32>
    %c0_17 = arith.constant 0 : index
    %c0_18 = arith.constant 0 : index
    %25 = vector.load %arg6[%c0_17, %c0_18] : memref<1x128xf32, #tpu.memory_space<vmem>>, vector<1x128xf32>
    %26 = vector.broadcast %25 : vector<1x128xf32> to vector<128x128xf32>
    %27 = arith.addf %24, %26 : vector<128x128xf32>
    %28 = tpu.iota {dimensions = array<i32: 1>} : vector<128x128xi32>
    %c8_i32 = arith.constant 8 : i32
    %29 = vector.broadcast %c8_i32 : i32 to vector<128x128xi32>
    %30 = arith.cmpi slt, %28, %29 : vector<128x128xi32>
    %cst_19 = arith.constant 0xFF800000 : f32
    %31 = vector.broadcast %cst_19 : f32 to vector<128x128xf32>
    %32 = arith.select %30, %27, %31 : vector<128x128xi1>, vector<128x128xf32>
    %cst_20 = arith.constant dense<0xFF800000> : vector<128xf32>
    %33 = vector.multi_reduction <maximumf>, %32, %cst_20 [1] : vector<128x128xf32> to vector<128xf32>
    %34 = vector.shape_cast %33 : vector<128xf32> to vector<128x1xf32>
    %35 = vector.broadcast %34 : vector<128x1xf32> to vector<128x128xf32>
    %36 = arith.subf %32, %35 : vector<128x128xf32>
    %37 = math.exp %36 : vector<128x128xf32>
    %cst_21 = arith.constant dense<0.000000e+00> : vector<128xf32>
    %38 = vector.multi_reduction <add>, %37, %cst_21 [1] : vector<128x128xf32> to vector<128xf32>
    %39 = vector.shape_cast %38 : vector<128xf32> to vector<128x1xf32>
    %40 = math.log %39 : vector<128x1xf32>
    %41 = vector.broadcast %40 : vector<128x1xf32> to vector<128x128xf32>
    %42 = arith.subf %36, %41 : vector<128x128xf32>
    %c0_22 = arith.constant 0 : index
    %c0_23 = arith.constant 0 : index
    %43 = vector.load %arg7[%c0_22, %c0_23] : memref<128x128xf32, #tpu.memory_space<vmem>>, vector<128x128xf32>
    tpu.vector_store %arg7[%c0_22, %c0_23], %42 {strides = array<i32>} : memref<128x128xf32, #tpu.memory_space<vmem>>, vector<128x128xf32>,
    return
  }
}

</mosaic_0001>

<bundles_post_ra>
// kernel: tpu_custom_call.1
= control target key start
LH: loop header
LB: loop body
LE: loop exit
PB: predicated region body
PF: predicated region fallthrough
CT: control target
= control target key end

     0   :  { %12 = vsyncpa [#allocation3], 0  ;;  %s1966_s0 = inlined_call_operand.vmem [shape: bf16[128,128], index: 0, kind: input, shape index: {}]   ;;  %s1967_s1 = inlined_call_operand.hbm [shape: s8[128,128], index: 1, kind: input, shape index: {}]   ;;  %s1968_s2 = inlined_call_operand.vmem [shape: f32[128,1], index: 2, kind: input, shape index: {}]   ;;  %s1969_s3 = inlined_call_operand.vmem [shape: bf16[128,128], index: 3, kind: input, shape index: {}]   ;;  %s1970_s4 = inlined_call_operand.vmem [shape: f32[1,128], index: 4, kind: input, shape index: {}]   ;;  %s1971_s5 = inlined_call_operand.hbm [shape: bf16[128,128], index: 5, kind: input, shape index: {}]   ;;  %s1972_s6 = inlined_call_operand.vmem [shape: f32[1,128], index: 6, kind: input, shape index: {}]   ;;  %s1973_s7 = inlined_call_operand.hbm [shape: f32[128,128], index: 7, kind: output, shape index: {}]  }
   0x1   :  { %13 = vsyncpa [#allocation6], 0 }
   0x2   :  { %14 = vsyncpa [#allocation4], 0  ;;  %s1463_s24 = smov [#allocation2]   ;;  %s1391_s28 = scalar_lea.hbm %s1967_s1, 512 }
   0x3   :  { %s22_s25 = sshll.u32 %s1463_s24, 4  ;;  %p1392_p0 = scmp.ne.s32.totalorder %s1967_s1, %s1391_s28  ;;  %s23_s25 = int_to_ptr.vmem [resolvable:$true] %s22_s25 }
   0x4   :  { %p1395_p1 = scmp.lt.u32.totalorder %s1391_s28, %s1967_s1 }
   0x6   :  { %p1397_p2 = pnand %p1395_p1, %p1392_p0 }
   0x8   :  { %1400 = shalt.err (!%p1397_p2)
}
   0x9   :  { %s1401_s10 = scalar_lea.vmem %s23_s25, 512  ;;  %p1406_p4 = scmp.lt.s32.totalorder %s23_s25, %s23_s25 }
   0xa   :  { %p1402_p3 = scmp.ne.s32.totalorder %s23_s25, %s1401_s10  ;;  %p1407_p5 = scmp.lt.s32.totalorder %s1401_s10, %s1401_s10 }
   0xc   :  { %p1408_p6 = por %p1407_p5, %p1406_p4 }
   0xe   :  { %p1409_p7 = pnand %p1408_p6, %p1402_p3 }
  0x10   :  { %1412 = shalt.err (!%p1409_p7)
}
  0x11   :  { %s1464_s11 = smov 128   ;;  %s1465_s12 = smov 8  }
  0x12   :  { %28 = dma.hbm_to_vmem [thread:$0]  %s1967_s1, 512, %s23_s25, [#allocation3], %s1464_s11, %s1464_s11, %s1465_s12  }
  0x13   :  { %s1466_s15 = smov [#allocation5]   ;;  %s1413_s19 = scalar_lea.hbm %s1971_s5, 1024 }
  0x14   :  { %s40_s16 = sshll.u32 %s1466_s15, 4  ;;  %p1414_p8 = scmp.ne.s32.totalorder %s1971_s5, %s1413_s19  ;;  %s41_s16 = int_to_ptr.vmem [resolvable:$true] %s40_s16 }
  0x15   :  { %p1417_p9 = scmp.lt.u32.totalorder %s1413_s19, %s1971_s5 }
  0x17   :  { %p1419_p10 = pnand %p1417_p9, %p1414_p8 }
  0x19   :  { %1422 = shalt.err (!%p1419_p10)
}
  0x1a   :  { %s1423_s24 = scalar_lea.vmem %s41_s16, 1024  ;;  %p1428_p12 = scmp.lt.s32.totalorder %s41_s16, %s41_s16 }
  0x1b   :  { %p1424_p11 = scmp.ne.s32.totalorder %s41_s16, %s1423_s24  ;;  %p1429_p13 = scmp.lt.s32.totalorder %s1423_s24, %s1423_s24 }
  0x1d   :  { %p1430_p0 = por %p1429_p13, %p1428_p12 }
  0x1f   :  { %p1431_p1 = pnand %p1430_p0, %p1424_p11 }
  0x21   :  { %1434 = shalt.err (!%p1431_p1)
}
  0x22   :  { %s1467_s1 = smov 64   ;;  %s1468_s25 = smov 4  }
  0x23   :  { %46 = dma.hbm_to_vmem [thread:$0]  %s1971_s5, 1024, %s41_s16, [#allocation6], %s1467_s1, %s1467_s1, %s1468_s25  }
  0x24   :  { %1457 = dma.done.wait [#allocation3], 512  }
  0x25   :  { %1458 = vsyncadd [#allocation3], 4294966784 }
  0x26   :  { %1459 = dma.done.wait [#allocation6], 1024  }
  0x27   :  { %1460 = vsyncadd [#allocation6], 4294966272  ;;  %v1303_v0 = vld [vmem:[%s1969_s3] sm:$0xff]   ;;  %v1304_v1 = vld [vmem:[%s1969_s3 + $0x8] sm:$0xff]   ;;  %v1469_v20 = vmov 0  }
  0x28   :  { %1165 = vmatprep.subr.bf16.mxu0 %v1303_v0  ;;  %v1305_v2 = vld [vmem:[%s1969_s3 + $0x10] sm:$0xff]   ;;  %v1306_v3 = vld [vmem:[%s1969_s3 + $0x18] sm:$0xff]   ;;  %v1311_v4 = vld [vmem:[%s1966_s0] sm:$0xff]   ;;  %1301 = vset.pattern.permute.xlu0 %v1469_v20 }
  0x29   :  { %1166 = vmatpush3.bf16.msra.mxu0 %v1303_v0  ;;  %1181 = vmatprep.mubr.bf16.mxu0 %v1311_v4  ;;  %v1307_v5 = vld [vmem:[%s1969_s3 + $0x20] sm:$0xff]   ;;  %v1308_v6 = vld [vmem:[%s1969_s3 + $0x28] sm:$0xff]   ;;  %v1309_v7 = vld [vmem:[%s1969_s3 + $0x30] sm:$0xff]  }
  0x2a   :  { %1167 = vmatprep.subr.bf16.mxu0 %v1304_v1  ;;  %v1310_v8 = vld [vmem:[%s1969_s3 + $0x38] sm:$0xff]   ;;  %v1312_v9 = vld [vmem:[%s1966_s0 + $0x8] sm:$0xff]   ;;  %v1313_v10 = vld [vmem:[%s1966_s0 + $0x10] sm:$0xff]   ;;  %1302 = vset.pattern.permute.xlu1 %v1469_v20 }
  0x2b   :  { %v1314_v11 = vld [vmem:[%s1966_s0 + $0x18] sm:$0xff]   ;;  %v1315_v12 = vld [vmem:[%s1966_s0 + $0x20] sm:$0xff]   ;;  %v1316_v13 = vld [vmem:[%s1966_s0 + $0x28] sm:$0xff]  }
  0x2c   :  { %v1317_v14 = vld [vmem:[%s1966_s0 + $0x30] sm:$0xff]   ;;  %v1318_v15 = vld [vmem:[%s1966_s0 + $0x38] sm:$0xff]   ;;  %v1586_v16 = vld [vmem:[#allocation2] sm:$0xff] }
  0x2d   :  { %1168 = vmatpush3.bf16.msra.mxu0 %v1304_v1  ;;  %v60_v17 = vunpack.c.l.s8.bf16 %v1586_v16  ;;  %v398_v18 = vld [vmem:[%s1968_s2] sm:$0xff]  ;;  %v400_v19 = vld [vmem:[%s1968_s2 + $0x10] sm:$0xff]  ;;  %v399_v21 = vld [vmem:[%s1968_s2 + $0x8] sm:$0xff]  ;;  %v61_v1 = vunpack.c.h.s8.bf16 %v1586_v16  ;;  %v862_v16 = vlaneseq }
  0x2e   :  { %1169 = vmatprep.subr.bf16.mxu0 %v1305_v2  ;;  %416 = vperm.xlu0 %1301, %v398_v18   ;;  %v401_v22 = vld [vmem:[%s1968_s2 + $0x18] sm:$0xff]  ;;  %v402_v23 = vld [vmem:[%s1968_s2 + $0x20] sm:$0xff]  ;;  %v403_v24 = vld [vmem:[%s1968_s2 + $0x28] sm:$0xff] }
  0x2f   :  { %1213 = vmatprep.mubr.bf16.mxu1 %v60_v17  ;;  %426 = vperm.xlu1 %1302, %v400_v19   ;;  %v1319_v25 = vld [vmem:[#allocation5] sm:$0xff]   ;;  %v404_v26 = vld [vmem:[%s1968_s2 + $0x30] sm:$0xff]  ;;  %v405_v27 = vld [vmem:[%s1968_s2 + $0x38] sm:$0xff] }
  0x30   :  { %v1320_v28 = vld [vmem:[#allocation5 + $0x8] sm:$0xff]   ;;  %v406_v29 = vld [vmem:[%s1968_s2 + $0x40] sm:$0xff]  ;;  %v1321_v31 = vld [vmem:[#allocation5 + $0x10] sm:$0xff]  }
  0x31   :  { %1170 = vmatpush3.bf16.msra.mxu0 %v1305_v2  ;;  %v407_v30 = vld [vmem:[%s1968_s2 + $0x48] sm:$0xff]  ;;  %v408_v32 = vld [vmem:[%s1968_s2 + $0x50] sm:$0xff]  ;;  %v409_v33 = vld [vmem:[%s1968_s2 + $0x58] sm:$0xff] }
  0x32   :  { %1171 = vmatprep.subr.bf16.mxu0 %v1306_v3  ;;  %421 = vperm.xlu0 %1301, %v399_v21   ;;  %v1322_v34 = vld [vmem:[#allocation5 + $0x18] sm:$0xff]   ;;  %v410_v35 = vld [vmem:[%s1968_s2 + $0x60] sm:$0xff]  ;;  %v411_v36 = vld [vmem:[%s1968_s2 + $0x68] sm:$0xff] }
  0x33   :  { %431 = vperm.xlu1 %1302, %v401_v22   ;;  %v1323_v37 = vld [vmem:[#allocation5 + $0x20] sm:$0xff]   ;;  %v412_v38 = vld [vmem:[%s1968_s2 + $0x70] sm:$0xff]  ;;  %v413_v39 = vld [vmem:[%s1968_s2 + $0x78] sm:$0xff] }
  0x34   :  { %v1639_v0 = vld [vmem:[#allocation2 + $0x8] sm:$0xff]  ;;  %v1685_v22 = vld [vmem:[%s1970_s4] ss:$0 sm:$0xff] }
  0x35   :  { %1172 = vmatpush3.bf16.msra.mxu0 %v1306_v3  ;;  %v62_v2 = vunpack.c.l.s8.bf16 %v1639_v0  ;;  %v1647_v3 = vld [vmem:[#allocation2 + $0x10] sm:$0xff]  ;;  %v63_v4 = vunpack.c.h.s8.bf16 %v1639_v0  ;;  %v1756_v0 = vld [vmem:[%s1972_s6] ss:$0 sm:$0xff]  ;;  %s1470_s6 = smov [#allocation7]  }
  0x36   :  { %1173 = vmatprep.subr.bf16.mxu0 %v1307_v5  ;;  %436 = vperm.xlu0 %1301, %v402_v23   ;;  %s1062_s22 = sshll.u32 %s1470_s6, 4  ;;  %s1063_s22 = int_to_ptr.vmem [resolvable:$true] %s1062_s22 }
  0x37   :  { %441 = vperm.xlu1 %1302, %v403_v24   ;;  %s1435_s23 = scalar_lea.vmem %s1063_s22, 2048  ;;  %p1440_p3 = scmp.lt.s32.totalorder %s1063_s22, %s1063_s22 }
  0x38   :  { %p1436_p2 = scmp.ne.s32.totalorder %s1063_s22, %s1435_s23  ;;  %p1441_p4 = scmp.lt.s32.totalorder %s1435_s23, %s1435_s23 }
  0x39   :  { %1174 = vmatpush3.bf16.msra.mxu0 %v1307_v5  ;;  %v64_v5 = vunpack.c.l.s8.bf16 %v1647_v3 }
  0x3a   :  { %1175 = vmatprep.subr.bf16.mxu0 %v1308_v6  ;;  %446 = vperm.xlu0 %1301, %v404_v26   ;;  %p1442_p5 = por %p1441_p4, %p1440_p3 }
  0x3b   :  { %451 = vperm.xlu1 %1302, %v405_v27  }
  0x3c   :  { %p1443_p6 = pnand %p1442_p5, %p1436_p2 }
  0x3d   :  { %1176 = vmatpush3.bf16.msra.mxu0 %v1308_v6  ;;  %v1655_v6 = vld [vmem:[#allocation2 + $0x18] sm:$0xff] }
  0x3e   :  { %1177 = vmatprep.subr.bf16.mxu0 %v1309_v7  ;;  %456 = vperm.xlu0 %1301, %v406_v29  }
  0x3f   :  { %461 = vperm.xlu1 %1302, %v407_v30  }
  0x41   :  { %1178 = vmatpush3.bf16.msra.mxu0 %v1309_v7  ;;  %v65_v7 = vunpack.c.h.s8.bf16 %v1647_v3 }
  0x42   :  { %1179 = vmatprep.subr.bf16.mxu0 %v1310_v8  ;;  %466 = vperm.xlu0 %1301, %v408_v32  }
  0x43   :  { %471 = vperm.xlu1 %1302, %v409_v33  }
  0x45   :  { %1180 = vmatpush3.bf16.msra.mxu0 %v1310_v8  ;;  %v66_v8 = vunpack.c.l.s8.bf16 %v1655_v6 }
  0x46   :  { %1229 = vmatprep.subr.bf16.mxu0 %v1319_v25  ;;  %476 = vperm.xlu0 %1301, %v410_v35  }
  0x47   :  { %481 = vperm.xlu1 %1302, %v411_v36  }
  0x48   :  { %1182 = vmatmul.mubr.bf16.vlgmr.msra.gmra.mrb[0].mxu0 %v1312_v9  ;;  %v67_v9 = vunpack.c.h.s8.bf16 %v1655_v6 }
  0x49   :  { %1185 = vmatprep.mubr.bf16.mxu0 %v1313_v10  ;;  %1230 = vmatpush3.bf16.msra.mxu0 %v1319_v25  ;;  %v1324_v10 = vld [vmem:[#allocation5 + $0x28] sm:$0xff]  }
  0x4a   :  { %1231 = vmatprep.subr.bf16.mxu0 %v1320_v28  ;;  %486 = vperm.xlu0 %1301, %v412_v38  }
  0x4b   :  { %491 = vperm.xlu1 %1302, %v413_v39  }
  0x4d   :  { %1232 = vmatpush3.bf16.msra.mxu0 %v1320_v28 }
  0x4e   :  { %1233 = vmatprep.subr.bf16.mxu0 %v1321_v31 }
  0x50   :  { %1186 = vmatmul.mubr.bf16.gmra.mrb[4].mxu0 %v1314_v11  ;;  %v1325_v11 = vld [vmem:[#allocation5 + $0x30] sm:$0xff]  }
  0x51   :  { %1189 = vmatprep.mubr.bf16.mxu0 %v1315_v12  ;;  %1234 = vmatpush3.bf16.msra.mxu0 %v1321_v31  ;;  %v1326_v12 = vld [vmem:[#allocation5 + $0x38] sm:$0xff]  }
  0x52   :  { %1235 = vmatprep.subr.bf16.mxu0 %v1322_v34 }
  0x55   :  { %1236 = vmatpush3.bf16.msra.mxu0 %v1322_v34 }
  0x56   :  { %1237 = vmatprep.subr.bf16.mxu0 %v1323_v37 }
  0x58   :  { %1190 = vmatmul.mubr.bf16.gmra.mrb[8].mxu0 %v1316_v13 }
  0x59   :  { %1193 = vmatprep.mubr.bf16.mxu0 %v1317_v14  ;;  %1238 = vmatpush3.bf16.msra.mxu0 %v1323_v37 }
  0x5a   :  { %1239 = vmatprep.subr.bf16.mxu0 %v1324_v10 }
  0x5d   :  { %1240 = vmatpush3.bf16.msra.mxu0 %v1324_v10 }
  0x5e   :  { %1241 = vmatprep.subr.bf16.mxu0 %v1325_v11 }
  0x60   :  { %1194 = vmatmul.mubr.bf16.gmra.mrb[12].mxu0 %v1318_v15 }
  0x61   :  { %1242 = vmatpush3.bf16.msra.mxu0 %v1325_v11 }
  0x62   :  { %1243 = vmatprep.subr.bf16.mxu0 %v1326_v12 }
  0x65   :  { %1244 = vmatpush3.bf16.msra.mxu0 %v1326_v12 }
  0xad   :  { %v1668_v13 = vpop.permute.xlu0 %416 }
  0xae   :  { %v1670_v14 = vpop.permute.xlu1 %426 }
  0xb1   :  { %v1672_v15 = vpop.permute.xlu0 %421 }
  0xb2   :  { %v1674_v18 = vpop.permute.xlu1 %431 }
  0xb5   :  { %v1676_v19 = vpop.permute.xlu0 %436 }
  0xb9   :  { %v1680_v20 = vpop.permute.xlu0 %446 }
  0xbd   :  { %v1696_v34 = vpop.permute.xlu0 %456 }
 0x11b   :  { %v1183_v40 = vpop.f32.mrb[0].mxu0 }
 0x11c   :  { %v230_v41 = vpop.f32.mrb[1].mxu0 }
 0x11d   :  { %v1184_v42 = vpop.f32.mrb[2].mxu0 }
 0x11e   :  { %v294_v43 = vpack.c.bf16 %v1184_v42, %v1183_v40  ;;  %v233_v44 = vpop.f32.mrb[3].mxu0 }
 0x11f   :  { %v293_v45 = vpack.c.bf16 %v233_v44, %v230_v41 }
 0x121   :  { %1197 = vmatprep.subr.bf16.mxu1 %v293_v45 }
 0x122   :  { %1198 = vmatpush3.bf16.msra.mxu1 %v293_v45 }
 0x123   :  { %v1187_v46 = vpop.f32.mrb[4].mxu0  ;;  %1199 = vmatprep.subr.bf16.mxu1 %v294_v43 }
 0x124   :  { %v246_v47 = vpop.f32.mrb[5].mxu0 }
 0x125   :  { %v1188_v48 = vpop.f32.mrb[6].mxu0 }
 0x126   :  { %v296_v49 = vpack.c.bf16 %v1188_v48, %v1187_v46  ;;  %v249_v50 = vpop.f32.mrb[7].mxu0  ;;  %1200 = vmatpush3.bf16.msra.mxu1 %v294_v43 }
 0x127   :  { %v295_v51 = vpack.c.bf16 %v249_v50, %v246_v47 }
 0x129   :  { %1201 = vmatprep.subr.bf16.mxu1 %v295_v51 }
 0x12a   :  { %1202 = vmatpush3.bf16.msra.mxu1 %v295_v51  ;;  %v1705_v51 = vpop.permute.xlu0 %466 }
 0x12b   :  { %v1191_v52 = vpop.f32.mrb[8].mxu0  ;;  %1203 = vmatprep.subr.bf16.mxu1 %v296_v49 }
 0x12c   :  { %v262_v53 = vpop.f32.mrb[9].mxu0 }
 0x12d   :  { %v1192_v54 = vpop.f32.mrb[10].mxu0 }
 0x12e   :  { %v298_v55 = vpack.c.bf16 %v1192_v54, %v1191_v52  ;;  %v265_v56 = vpop.f32.mrb[11].mxu0  ;;  %1204 = vmatpush3.bf16.msra.mxu1 %v296_v49  ;;  %v1714_v11 = vpop.permute.xlu0 %476 }
 0x12f   :  { %v297_v57 = vpack.c.bf16 %v265_v56, %v262_v53 }
 0x131   :  { %1205 = vmatprep.subr.bf16.mxu1 %v297_v57 }
 0x132   :  { %1206 = vmatpush3.bf16.msra.mxu1 %v297_v57 }
 0x133   :  { %v1195_v58 = vpop.f32.mrb[12].mxu0  ;;  %1207 = vmatprep.subr.bf16.mxu1 %v298_v55 }
 0x134   :  { %v278_v59 = vpop.f32.mrb[13].mxu0 }
 0x135   :  { %v1196_v60 = vpop.f32.mrb[14].mxu0 }
 0x136   :  { %v300_v61 = vpack.c.bf16 %v1196_v60, %v1195_v58  ;;  %v281_v62 = vpop.f32.mrb[15].mxu0  ;;  %1208 = vmatpush3.bf16.msra.mxu1 %v298_v55 }
 0x137   :  { %v299_v63 = vpack.c.bf16 %v281_v62, %v278_v59 }
 0x139   :  { %1209 = vmatprep.subr.bf16.mxu1 %v299_v63 }
 0x13a   :  { %1210 = vmatpush3.bf16.msra.mxu1 %v299_v63 }
 0x13b   :  { %1211 = vmatprep.subr.bf16.mxu1 %v300_v61 }
 0x13e   :  { %1212 = vmatpush3.bf16.msra.mxu1 %v300_v61 }
 0x141   :  { %1214 = vmatmul.mubr.bf16.vlgmr.msra.gmra.mrb[0].mxu1 %v61_v1 }
 0x142   :  { %1217 = vmatprep.mubr.bf16.mxu1 %v62_v2 }
 0x149   :  { %1218 = vmatmul.mubr.bf16.gmra.mrb[4].mxu1 %v63_v4 }
 0x14a   :  { %1221 = vmatprep.mubr.bf16.mxu1 %v64_v5 }
 0x151   :  { %1222 = vmatmul.mubr.bf16.gmra.mrb[8].mxu1 %v65_v7 }
 0x152   :  { %1225 = vmatprep.mubr.bf16.mxu1 %v66_v8 }
 0x159   :  { %1226 = vmatmul.mubr.bf16.gmra.mrb[12].mxu1 %v67_v9 }
 0x15a   :  { %1277 = vmatprep.mubr.bf16.mxu1 %v60_v17  ;;  %v1678_v17 = vpop.permute.xlu1 %441 }
 0x15e   :  { %v1688_v25 = vpop.permute.xlu1 %451 }
 0x162   :  { %v1699_v38 = vpop.permute.xlu1 %461 }
 0x166   :  { %v1710_v55 = vpop.permute.xlu1 %471 }
 0x214   :  { %v1215_v21 = vpop.f32.mrb[0].mxu1 }
 0x215   :  { %v496_v23 = vmul.f32 %v1215_v21, %v1670_v14  ;;  %v335_v24 = vpop.f32.mrb[1].mxu1 }
 0x216   :  { %v494_v26 = vmul.f32 %v1668_v13, %v335_v24  ;;  %v1216_v27 = vpop.f32.mrb[2].mxu1 }
 0x217   :  { %v519_v28 = vadd.f32 %v1685_v22, %v496_v23  ;;  %v497_v29 = vmul.f32 %v1216_v27, %v1674_v18  ;;  %v338_v30 = vpop.f32.mrb[3].mxu1 }
 0x218   :  { %v517_v31 = vadd.f32 %v1685_v22, %v494_v26  ;;  %v495_v32 = vmul.f32 %v1672_v15, %v338_v30 }
 0x219   :  { %v520_v33 = vadd.f32 %v1685_v22, %v497_v29  ;;  %v535_v36 = vmax.f32 %v519_v28, 0.0  ;;  %v1719_v28 = vpop.permute.xlu1 %481 }
 0x21a   :  { %v518_v35 = vadd.f32 %v1685_v22, %v495_v32  ;;  %v533_v39 = vmax.f32 %v517_v31, 0.0 }
 0x21b   :  { %v536_v37 = vmax.f32 %v520_v33, 0.0 }
 0x21c   :  { %v534_v40 = vmax.f32 %v518_v35, 0.0  ;;  %v1219_v41 = vpop.f32.mrb[4].mxu1 }
 0x21d   :  { %v550_v42 = vpack.c.bf16 %v536_v37, %v535_v36  ;;  %v500_v43 = vmul.f32 %v1219_v41, %v1680_v20  ;;  %v351_v44 = vpop.f32.mrb[5].mxu1  ;;  %v1725_v36 = vpop.permute.xlu0 %486 }
 0x21e   :  { %v498_v45 = vmul.f32 %v1676_v19, %v351_v44  ;;  %v1220_v46 = vpop.f32.mrb[6].mxu1  ;;  %v549_v47 = vpack.c.bf16 %v534_v40, %v533_v39  ;;  %v1728_v44 = vpop.permute.xlu1 %491 }
 0x21f   :  { %v523_v48 = vadd.f32 %v1685_v22, %v500_v43  ;;  %v501_v49 = vmul.f32 %v1220_v46, %v1688_v25  ;;  %v354_v50 = vpop.f32.mrb[7].mxu1 }
 0x220   :  { %v521_v52 = vadd.f32 %v1685_v22, %v498_v45  ;;  %v499_v53 = vmul.f32 %v1678_v17, %v354_v50  ;;  %1245 = vmatprep.mubr.bf16.mxu0 %v549_v47 }
 0x221   :  { %v524_v54 = vadd.f32 %v1685_v22, %v501_v49  ;;  %1246 = vmatmul.mubr.bf16.vlgmr.msra.gmra.mrb[16].mxu0 %v550_v42  ;;  %v539_v57 = vmax.f32 %v523_v48, 0.0 }
 0x222   :  { %v522_v56 = vadd.f32 %v1685_v22, %v499_v53  ;;  %v537_v59 = vmax.f32 %v521_v52, 0.0 }
 0x223   :  { %v540_v58 = vmax.f32 %v524_v54, 0.0 }
 0x224   :  { %v538_v60 = vmax.f32 %v522_v56, 0.0  ;;  %v1223_v61 = vpop.f32.mrb[8].mxu1 }
 0x225   :  { %v504_v62 = vmul.f32 %v1223_v61, %v1705_v51  ;;  %v367_v63 = vpop.f32.mrb[9].mxu1  ;;  %v552_v10 = vpack.c.bf16 %v540_v58, %v539_v57 }
 0x226   :  { %v502_v12 = vmul.f32 %v1696_v34, %v367_v63  ;;  %v1224_v21 = vpop.f32.mrb[10].mxu1  ;;  %v551_v23 = vpack.c.bf16 %v538_v60, %v537_v59 }
 0x227   :  { %v527_v24 = vadd.f32 %v1685_v22, %v504_v62  ;;  %v505_v26 = vmul.f32 %v1224_v21, %v1710_v55  ;;  %v370_v27 = vpop.f32.mrb[11].mxu1 }
 0x228   :  { %v525_v29 = vadd.f32 %v1685_v22, %v502_v12  ;;  %v503_v30 = vmul.f32 %v1699_v38, %v370_v27  ;;  %1249 = vmatprep.mubr.bf16.mxu0 %v551_v23 }
 0x229   :  { %v528_v31 = vadd.f32 %v1685_v22, %v505_v26  ;;  %1250 = vmatmul.mubr.bf16.gmra.mrb[20].mxu0 %v552_v10  ;;  %v543_v33 = vmax.f32 %v527_v24, 0.0 }
 0x22a   :  { %v526_v32 = vadd.f32 %v1685_v22, %v503_v30  ;;  %v541_v37 = vmax.f32 %v525_v29, 0.0 }
 0x22b   :  { %v544_v35 = vmax.f32 %v528_v31, 0.0 }
 0x22c   :  { %v542_v39 = vmax.f32 %v526_v32, 0.0  ;;  %v1227_v40 = vpop.f32.mrb[12].mxu1 }
 0x22d   :  { %v508_v41 = vmul.f32 %v1227_v40, %v1725_v36  ;;  %v383_v42 = vpop.f32.mrb[13].mxu1  ;;  %v554_v43 = vpack.c.bf16 %v544_v35, %v543_v33 }
 0x22e   :  { %v506_v45 = vmul.f32 %v1714_v11, %v383_v42  ;;  %v1228_v46 = vpop.f32.mrb[14].mxu1  ;;  %v553_v47 = vpack.c.bf16 %v542_v39, %v541_v37 }
 0x22f   :  { %v531_v48 = vadd.f32 %v1685_v22, %v508_v41  ;;  %v509_v49 = vmul.f32 %v1228_v46, %v1728_v44  ;;  %v386_v50 = vpop.f32.mrb[15].mxu1 }
 0x230   :  { %v529_v52 = vadd.f32 %v1685_v22, %v506_v45  ;;  %v507_v53 = vmul.f32 %v1719_v28, %v386_v50  ;;  %1253 = vmatprep.mubr.bf16.mxu0 %v553_v47 }
 0x231   :  { %v532_v54 = vadd.f32 %v1685_v22, %v509_v49  ;;  %1254 = vmatmul.mubr.bf16.gmra.mrb[24].mxu0 %v554_v43  ;;  %v547_v57 = vmax.f32 %v531_v48, 0.0 }
 0x232   :  { %v530_v56 = vadd.f32 %v1685_v22, %v507_v53  ;;  %v545_v59 = vmax.f32 %v529_v52, 0.0 }
 0x233   :  { %v548_v58 = vmax.f32 %v532_v54, 0.0 }
 0x234   :  { %v546_v60 = vmax.f32 %v530_v56, 0.0 }
 0x235   :  { %v556_v61 = vpack.c.bf16 %v548_v58, %v547_v57 }
 0x236   :  { %v555_v62 = vpack.c.bf16 %v546_v60, %v545_v59 }
 0x238   :  { %1257 = vmatprep.mubr.bf16.mxu0 %v555_v62 }
 0x239   :  { %1258 = vmatmul.mubr.bf16.gmra.mrb[28].mxu0 %v556_v61 }
 0x2f4   :  { %v1247_v63 = vpop.f32.mrb[16].mxu0 }
 0x2f5   :  { %v655_v10 = vpop.f32.mrb[17].mxu0 }
 0x2f6   :  { %v1248_v12 = vpop.f32.mrb[18].mxu0 }
 0x2f7   :  { %v719_v21 = vpack.c.bf16 %v1248_v12, %v1247_v63  ;;  %v658_v23 = vpop.f32.mrb[19].mxu0 }
 0x2f8   :  { %v718_v24 = vpack.c.bf16 %v658_v23, %v655_v10 }
 0x2fa   :  { %1261 = vmatprep.subr.bf16.mxu1 %v718_v24 }
 0x2fb   :  { %1262 = vmatpush3.bf16.msra.mxu1 %v718_v24 }
 0x2fc   :  { %v1251_v26 = vpop.f32.mrb[20].mxu0  ;;  %1263 = vmatprep.subr.bf16.mxu1 %v719_v21 }
 0x2fd   :  { %v671_v27 = vpop.f32.mrb[21].mxu0 }
 0x2fe   :  { %v1252_v22 = vpop.f32.mrb[22].mxu0 }
 0x2ff   :  { %v721_v29 = vpack.c.bf16 %v1252_v22, %v1251_v26  ;;  %v674_v30 = vpop.f32.mrb[23].mxu0  ;;  %1264 = vmatpush3.bf16.msra.mxu1 %v719_v21 }
 0x300   :  { %v720_v31 = vpack.c.bf16 %v674_v30, %v671_v27 }
 0x302   :  { %1265 = vmatprep.subr.bf16.mxu1 %v720_v31 }
 0x303   :  { %1266 = vmatpush3.bf16.msra.mxu1 %v720_v31 }
 0x304   :  { %v1255_v32 = vpop.f32.mrb[24].mxu0  ;;  %1267 = vmatprep.subr.bf16.mxu1 %v721_v29 }
 0x305   :  { %v687_v33 = vpop.f32.mrb[25].mxu0 }
 0x306   :  { %v1256_v35 = vpop.f32.mrb[26].mxu0 }
 0x307   :  { %v723_v37 = vpack.c.bf16 %v1256_v35, %v1255_v32  ;;  %v690_v39 = vpop.f32.mrb[27].mxu0  ;;  %1268 = vmatpush3.bf16.msra.mxu1 %v721_v29 }
 0x308   :  { %v722_v40 = vpack.c.bf16 %v690_v39, %v687_v33 }
 0x30a   :  { %1269 = vmatprep.subr.bf16.mxu1 %v722_v40 }
 0x30b   :  { %1270 = vmatpush3.bf16.msra.mxu1 %v722_v40 }
 0x30c   :  { %v1259_v41 = vpop.f32.mrb[28].mxu0  ;;  %1271 = vmatprep.subr.bf16.mxu1 %v723_v37 }
 0x30d   :  { %v703_v42 = vpop.f32.mrb[29].mxu0 }
 0x30e   :  { %v1260_v43 = vpop.f32.mrb[30].mxu0 }
 0x30f   :  { %v725_v45 = vpack.c.bf16 %v1260_v43, %v1259_v41  ;;  %v706_v46 = vpop.f32.mrb[31].mxu0  ;;  %1272 = vmatpush3.bf16.msra.mxu1 %v723_v37 }
 0x310   :  { %v724_v47 = vpack.c.bf16 %v706_v46, %v703_v42 }
 0x312   :  { %1273 = vmatprep.subr.bf16.mxu1 %v724_v47 }
 0x313   :  { %1274 = vmatpush3.bf16.msra.mxu1 %v724_v47 }
 0x314   :  { %1275 = vmatprep.subr.bf16.mxu1 %v725_v45 }
 0x317   :  { %1276 = vmatpush3.bf16.msra.mxu1 %v725_v45 }
 0x31a   :  { %1278 = vmatmul.mubr.bf16.vlgmr.msra.gmra.mrb[16].mxu1 %v61_v1  ;;  %v1751_v1 = vand.u32 127, %v862_v16 }
 0x31b   :  { %1281 = vmatprep.mubr.bf16.mxu1 %v62_v2 }
 0x31c   :  { %vm864_vm0 = vcmp.lt.s32.totalorder %v1751_v1, 8 }
 0x322   :  { %1282 = vmatmul.mubr.bf16.gmra.mrb[20].mxu1 %v63_v4 }
 0x323   :  { %1285 = vmatprep.mubr.bf16.mxu1 %v64_v5 }
 0x32a   :  { %1286 = vmatmul.mubr.bf16.gmra.mrb[24].mxu1 %v65_v7 }
 0x32b   :  { %1289 = vmatprep.mubr.bf16.mxu1 %v66_v8 }
 0x332   :  { %1290 = vmatmul.mubr.bf16.gmra.mrb[28].mxu1 %v67_v9 }
 0x3ed   :  { %v1279_v48 = vpop.f32.mrb[16].mxu1 }
 0x3ee   :  { %v825_v2 = vmul.f32 %v1279_v48, %v1670_v14  ;;  %v760_v4 = vpop.f32.mrb[17].mxu1 }
 0x3ef   :  { %v823_v3 = vmul.f32 %v760_v4, %v1668_v13  ;;  %v1280_v5 = vpop.f32.mrb[18].mxu1 }
 0x3f0   :  { %v763_v7 = vpop.f32.mrb[19].mxu1  ;;  %v848_v6 = vadd.f32 %v1756_v0, %v825_v2  ;;  %v826_v9 = vmul.f32 %v1280_v5, %v1674_v18 }
 0x3f1   :  { %v824_v8 = vmul.f32 %v763_v7, %v1672_v15  ;;  %v846_v50 = vadd.f32 %v1756_v0, %v823_v3 }
 0x3f2   :  { %v1766_v49 = vsel %vm864_vm0, %v848_v6, -inf  ;;  %v849_v54 = vadd.f32 %v1756_v0, %v826_v9 }
 0x3f3   :  { %885 = vmax.xlane.f32.xlu0 %v1766_v49  ;;  %v847_v13 = vadd.f32 %v1756_v0, %v824_v8  ;;  %v1779_v18 = vsel %vm864_vm0, %v846_v50, -inf }
 0x3f4   :  { %v1789_v61 = vsel %vm864_vm0, %v849_v54, -inf }
 0x3f5   :  { %v1283_v14 = vpop.f32.mrb[20].mxu1  ;;  %v1773_v52 = vsel %vm864_vm0, %v847_v13, -inf }
 0x3f6   :  { %v829_v53 = vmul.f32 %v1283_v14, %v1680_v20  ;;  %883 = vmax.xlane.f32.xlu1 %v1773_v52  ;;  %v776_v15 = vpop.f32.mrb[21].mxu1 }
 0x3f7   :  { %v827_v56 = vmul.f32 %v776_v15, %v1676_v19  ;;  %881 = vmax.xlane.f32.xlu0 %v1779_v18  ;;  %v1284_v57 = vpop.f32.mrb[22].mxu1 }
 0x3f8   :  { %v830_v58 = vmul.f32 %v1284_v57, %v1688_v25  ;;  %v779_v59 = vpop.f32.mrb[23].mxu1  ;;  %v852_v60 = vadd.f32 %v1756_v0, %v829_v53 }
 0x3f9   :  { %v828_v20 = vmul.f32 %v779_v59, %v1678_v17  ;;  %v850_v19 = vadd.f32 %v1756_v0, %v827_v56 }
 0x3fa   :  { %v1793_v62 = vsel %vm864_vm0, %v852_v60, -inf  ;;  %v853_v63 = vadd.f32 %v1756_v0, %v830_v58 }
 0x3fb   :  { %887 = vmax.xlane.f32.xlu0 %v1789_v61  ;;  %893 = vmax.xlane.f32.xlu1 %v1793_v62  ;;  %v851_v10 = vadd.f32 %v1756_v0, %v828_v20  ;;  %v1803_v21 = vsel %vm864_vm0, %v850_v19, -inf }
 0x3fc   :  { %v1807_v23 = vsel %vm864_vm0, %v853_v63, -inf }
 0x3fd   :  { %v1287_v25 = vpop.f32.mrb[24].mxu1  ;;  %v1816_v29 = vsel %vm864_vm0, %v851_v10, -inf }
 0x3fe   :  { %v833_v17 = vmul.f32 %v1287_v25, %v1705_v51  ;;  %v792_v12 = vpop.f32.mrb[25].mxu1 }
 0x3ff   :  { %v831_v24 = vmul.f32 %v792_v12, %v1696_v34  ;;  %889 = vmax.xlane.f32.xlu1 %v1803_v21  ;;  %895 = vmax.xlane.f32.xlu0 %v1807_v23  ;;  %v1288_v26 = vpop.f32.mrb[26].mxu1 }
 0x400   :  { %v834_v27 = vmul.f32 %v1288_v26, %v1710_v55  ;;  %v795_v22 = vpop.f32.mrb[27].mxu1  ;;  %v856_v51 = vadd.f32 %v1756_v0, %v833_v17 }
 0x401   :  { %v832_v30 = vmul.f32 %v795_v22, %v1699_v38  ;;  %v854_v34 = vadd.f32 %v1756_v0, %v831_v24 }
 0x402   :  { %v1821_v31 = vsel %vm864_vm0, %v856_v51, -inf  ;;  %v857_v32 = vadd.f32 %v1756_v0, %v834_v27 }
 0x403   :  { %891 = vmax.xlane.f32.xlu0 %v1816_v29  ;;  %901 = vmax.xlane.f32.xlu1 %v1821_v31  ;;  %v1829_v35 = vsel %vm864_vm0, %v854_v34, -inf  ;;  %v855_v37 = vadd.f32 %v1756_v0, %v832_v30 }
 0x404   :  { %v1833_v38 = vsel %vm864_vm0, %v857_v32, -inf }
 0x405   :  { %v1291_v55 = vpop.f32.mrb[28].mxu1  ;;  %v1845_v47 = vsel %vm864_vm0, %v855_v37, -inf }
 0x406   :  { %v808_v33 = vpop.f32.mrb[29].mxu1  ;;  %v837_v39 = vmul.f32 %v1291_v55, %v1725_v36 }
 0x407   :  { %v835_v40 = vmul.f32 %v808_v33, %v1714_v11  ;;  %897 = vmax.xlane.f32.xlu1 %v1829_v35  ;;  %903 = vmax.xlane.f32.xlu0 %v1833_v38  ;;  %v1292_v41 = vpop.f32.mrb[30].mxu1 }
 0x408   :  { %v811_v42 = vpop.f32.mrb[31].mxu1  ;;  %v838_v46 = vmul.f32 %v1292_v41, %v1728_v44  ;;  %v860_v16 = vadd.f32 %v1756_v0, %v837_v39 }
 0x409   :  { %v836_v43 = vmul.f32 %v811_v42, %v1719_v28  ;;  %v858_v45 = vadd.f32 %v1756_v0, %v835_v40 }
 0x40a   :  { %v861_v44 = vadd.f32 %v1756_v0, %v838_v46  ;;  %v1863_v48 = vsel %vm864_vm0, %v860_v16, -inf }
 0x40b   :  { %899 = vmax.xlane.f32.xlu0 %v1845_v47  ;;  %v1850_v11 = vsel %vm864_vm0, %v858_v45, -inf  ;;  %v859_v36 = vadd.f32 %v1756_v0, %v836_v43 }
 0x40c   :  { %905 = vmax.xlane.f32.xlu1 %v1850_v11  ;;  %v1868_v2 = vsel %vm864_vm0, %v861_v44, -inf }
 0x40d   :  { %v1857_v28 = vsel %vm864_vm0, %v859_v36, -inf }
 0x40f   :  { %907 = vmax.xlane.f32.xlu0 %v1857_v28 }
 0x410   :  { %909 = vmax.xlane.f32.xlu1 %v1863_v48 }
 0x413   :  { %911 = vmax.xlane.f32.xlu0 %v1868_v2 }
 0x480   :  { %v886_v4 = vpop.xlane.xlu0 %885 }
 0x481   :  { %v1872_v3 = vsub.f32 %v1766_v49, %v886_v4 }
 0x483   :  { %v933_v0 = vmul.f32 1.442695, %v1872_v3  ;;  %v884_v5 = vpop.xlane.xlu1 %883 }
 0x484   :  { %v882_v7 = vpop.xlane.xlu0 %881  ;;  %v1880_v1 = vsub.f32 %v1773_v52, %v884_v5 }
 0x485   :  { %1327 = vpow2.f32 %v933_v0  ;;  %v1876_v6 = vsub.f32 %v1779_v18, %v882_v7 }
 0x486   :  { %v931_v15 = vmul.f32 1.442695, %v1880_v1 }
 0x487   :  { %v929_v8 = vmul.f32 1.442695, %v1876_v6 }
 0x488   :  { %v888_v9 = vpop.xlane.xlu0 %887  ;;  %v894_v50 = vpop.xlane.xlu1 %893 }
 0x489   :  { %1329 = vpow2.f32 %v929_v8  ;;  %v1883_v13 = vsub.f32 %v1789_v61, %v888_v9  ;;  %v1886_v49 = vsub.f32 %v1793_v62, %v894_v50 }
 0x48b   :  { %v935_v14 = vmul.f32 1.442695, %v1883_v13  ;;  %v941_v53 = vmul.f32 1.442695, %v1886_v49 }
 0x48c   :  { %v890_v18 = vpop.xlane.xlu1 %889  ;;  %v896_v54 = vpop.xlane.xlu0 %895 }
 0x48d   :  { %1331 = vpow2.f32 %v935_v14  ;;  %v1892_v52 = vsub.f32 %v1803_v21, %v890_v18  ;;  %v1895_v56 = vsub.f32 %v1807_v23, %v896_v54 }
 0x48e   :  { %1333 = vpow2.f32 %v941_v53 }
 0x48f   :  { %v1328_v57 = vpop.eup %1327  ;;  %v937_v58 = vmul.f32 1.442695, %v1892_v52  ;;  %1335 = vpow2.f32 %v931_v15  ;;  %v943_v20 = vmul.f32 1.442695, %v1895_v56 }
 0x490   :  { %v892_v59 = vpop.xlane.xlu0 %891  ;;  %v902_v60 = vpop.xlane.xlu1 %901  ;;  %965 = vadd.xlane.f32.xlu1 %v1328_v57 }
 0x491   :  { %1337 = vpow2.f32 %v937_v58  ;;  %v1900_v61 = vsub.f32 %v1816_v29, %v892_v59  ;;  %v1903_v62 = vsub.f32 %v1821_v31, %v902_v60 }
 0x492   :  { %1339 = vpow2.f32 %v943_v20 }
 0x493   :  { %v1330_v19 = vpop.eup %1329  ;;  %v949_v63 = vmul.f32 1.442695, %v1903_v62  ;;  %v939_v25 = vmul.f32 1.442695, %v1900_v61 }
 0x494   :  { %v898_v10 = vpop.xlane.xlu1 %897  ;;  %v904_v17 = vpop.xlane.xlu0 %903  ;;  %961 = vadd.xlane.f32.xlu1 %v1330_v19 }
 0x495   :  { %v1908_v12 = vsub.f32 %v1829_v35, %v898_v10  ;;  %v1911_v21 = vsub.f32 %v1833_v38, %v904_v17  ;;  %1341 = vpow2.f32 %v949_v63 }
 0x496   :  { %1343 = vpow2.f32 %v939_v25 }
 0x497   :  { %v1332_v23 = vpop.eup %1331  ;;  %v945_v24 = vmul.f32 1.442695, %v1908_v12  ;;  %v951_v22 = vmul.f32 1.442695, %v1911_v21 }
 0x498   :  { %v1334_v26 = vpop.eup %1333  ;;  %v900_v27 = vpop.xlane.xlu0 %899  ;;  %967 = vadd.xlane.f32.xlu0 %v1332_v23 }
 0x499   :  { %1345 = vpow2.f32 %v945_v24  ;;  %v1916_v51 = vsub.f32 %v1845_v47, %v900_v27  ;;  %973 = vadd.xlane.f32.xlu1 %v1334_v26  ;;  %v906_v29 = vpop.xlane.xlu1 %905  ;;  %v1336_v30 = vpop.eup %1335 }
 0x49a   :  { %v1919_v31 = vsub.f32 %v1850_v11, %v906_v29  ;;  %1347 = vpow2.f32 %v951_v22 }
 0x49b   :  { %v1338_v34 = vpop.eup %1337  ;;  %v947_v33 = vmul.f32 1.442695, %v1916_v51 }
 0x49c   :  { %v953_v32 = vmul.f32 1.442695, %v1919_v31  ;;  %963 = vadd.xlane.f32.xlu0 %v1336_v30  ;;  %v908_v55 = vpop.xlane.xlu0 %907  ;;  %v1340_v39 = vpop.eup %1339 }
 0x49d   :  { %969 = vadd.xlane.f32.xlu1 %v1338_v34  ;;  %v1924_v35 = vsub.f32 %v1857_v28, %v908_v55  ;;  %v910_v38 = vpop.xlane.xlu1 %909 }
 0x49e   :  { %1349 = vpow2.f32 %v953_v32  ;;  %v1927_v37 = vsub.f32 %v1863_v48, %v910_v38 }
 0x49f   :  { %v1342_v40 = vpop.eup %1341  ;;  %1351 = vpow2.f32 %v947_v33  ;;  %v955_v43 = vmul.f32 1.442695, %v1924_v35 }
 0x4a0   :  { %v957_v41 = vmul.f32 1.442695, %v1927_v37  ;;  %975 = vadd.xlane.f32.xlu0 %v1340_v39  ;;  %v912_v42 = vpop.xlane.xlu0 %911  ;;  %v1344_v46 = vpop.eup %1343 }
 0x4a1   :  { %981 = vadd.xlane.f32.xlu1 %v1342_v40  ;;  %v1932_v45 = vsub.f32 %v1868_v2, %v912_v42 }
 0x4a2   :  { %1353 = vpow2.f32 %v957_v41 }
 0x4a3   :  { %v1346_v47 = vpop.eup %1345  ;;  %1355 = vpow2.f32 %v955_v43  ;;  %v959_v11 = vmul.f32 1.442695, %v1932_v45 }
 0x4a4   :  { %971 = vadd.xlane.f32.xlu0 %v1344_v46  ;;  %v1348_v36 = vpop.eup %1347 }
 0x4a5   :  { %977 = vadd.xlane.f32.xlu1 %v1346_v47  ;;  %1357 = vpow2.f32 %v959_v11 }
 0x4a8   :  { %v1350_v16 = vpop.eup %1349  ;;  %983 = vadd.xlane.f32.xlu0 %v1348_v36 }
 0x4a9   :  { %985 = vadd.xlane.f32.xlu1 %v1350_v16  ;;  %v1352_v28 = vpop.eup %1351 }
 0x4ac   :  { %v1354_v44 = vpop.eup %1353  ;;  %979 = vadd.xlane.f32.xlu0 %v1352_v28 }
 0x4ad   :  { %989 = vadd.xlane.f32.xlu1 %v1354_v44  ;;  %v1356_v48 = vpop.eup %1355 }
 0x4af   :  { %v1358_v2 = vpop.eup %1357 }
 0x4b0   :  { %987 = vadd.xlane.f32.xlu0 %v1356_v48 }
 0x4b4   :  { %991 = vadd.xlane.f32.xlu0 %v1358_v2 }
 0x51d   :  { %v966_v4 = vpop.xlane.xlu1 %965 }
 0x51e   :  { %1359 = vlog2.f32 %v966_v4 }
 0x521   :  { %v962_v0 = vpop.xlane.xlu1 %961 }
 0x522   :  { %1361 = vlog2.f32 %v962_v0 }
 0x525   :  { %v968_v5 = vpop.xlane.xlu0 %967 }
 0x526   :  { %v974_v7 = vpop.xlane.xlu1 %973  ;;  %1363 = vlog2.f32 %v968_v5 }
 0x527   :  { %1365 = vlog2.f32 %v974_v7 }
 0x528   :  { %v1360_v8 = vpop.eup %1359 }
 0x529   :  { %v998_v9 = vmul.f32 0.6931472, %v1360_v8  ;;  %v964_v50 = vpop.xlane.xlu0 %963 }
 0x52a   :  { %v970_v14 = vpop.xlane.xlu1 %969  ;;  %1367 = vlog2.f32 %v964_v50 }
 0x52b   :  { %v1027_v53 = vsub.f32 %v1872_v3, %v998_v9  ;;  %1369 = vlog2.f32 %v970_v14 }
 0x52c   :  { %v1362_v15 = vpop.eup %1361 }
 0x52d   :  { %1043 = vst [vmem:[#allocation7 + $0x10] sm:$0xff] %v1027_v53  ;;  %v994_v18 = vmul.f32 0.6931472, %v1362_v15  ;;  %v976_v54 = vpop.xlane.xlu0 %975 }
 0x52e   :  { %v982_v57 = vpop.xlane.xlu1 %981  ;;  %1371 = vlog2.f32 %v976_v54 }
 0x52f   :  { %v1025_v58 = vsub.f32 %v1876_v6, %v994_v18  ;;  %1373 = vlog2.f32 %v982_v57 }
 0x530   :  { %v1364_v59 = vpop.eup %1363 }
 0x531   :  { %v1366_v60 = vpop.eup %1365  ;;  %1041 = vst [vmem:[#allocation7] sm:$0xff] %v1025_v58  ;;  %v1000_v20 = vmul.f32 0.6931472, %v1364_v59  ;;  %v972_v19 = vpop.xlane.xlu0 %971 }
 0x532   :  { %v1006_v63 = vmul.f32 0.6931472, %v1366_v60  ;;  %v978_v25 = vpop.xlane.xlu1 %977  ;;  %1375 = vlog2.f32 %v972_v19 }
 0x533   :  { %v1028_v3 = vsub.f32 %v1883_v13, %v1000_v20  ;;  %1377 = vlog2.f32 %v978_v25 }
 0x534   :  { %v1368_v10 = vpop.eup %1367  ;;  %v1031_v17 = vsub.f32 %v1886_v49, %v1006_v63 }
 0x535   :  { %v1370_v23 = vpop.eup %1369  ;;  %1044 = vst [vmem:[#allocation7 + $0x18] sm:$0xff] %v1028_v3  ;;  %v996_v24 = vmul.f32 0.6931472, %v1368_v10  ;;  %v984_v26 = vpop.xlane.xlu0 %983 }
 0x536   :  { %1047 = vst [vmem:[#allocation7 + $0x30] sm:$0xff] %v1031_v17  ;;  %v1002_v6 = vmul.f32 0.6931472, %v1370_v23  ;;  %1379 = vlog2.f32 %v984_v26  ;;  %v986_v27 = vpop.xlane.xlu1 %985 }
 0x537   :  { %v1026_v22 = vsub.f32 %v1880_v1, %v996_v24  ;;  %1381 = vlog2.f32 %v986_v27 }
 0x538   :  { %v1372_v29 = vpop.eup %1371  ;;  %v1029_v30 = vsub.f32 %v1892_v52, %v1002_v6 }
 0x539   :  { %v1374_v34 = vpop.eup %1373  ;;  %1042 = vst [vmem:[#allocation7 + $0x8] sm:$0xff] %v1026_v22  ;;  %v1008_v13 = vmul.f32 0.6931472, %v1372_v29  ;;  %v980_v32 = vpop.xlane.xlu0 %979 }
 0x53a   :  { %1045 = vst [vmem:[#allocation7 + $0x20] sm:$0xff] %v1029_v30  ;;  %v1014_v49 = vmul.f32 0.6931472, %v1374_v34  ;;  %1383 = vlog2.f32 %v980_v32  ;;  %v990_v55 = vpop.xlane.xlu1 %989 }
 0x53b   :  { %v1032_v33 = vsub.f32 %v1895_v56, %v1008_v13  ;;  %1385 = vlog2.f32 %v990_v55 }
 0x53c   :  { %v1376_v38 = vpop.eup %1375  ;;  %v1035_v39 = vsub.f32 %v1903_v62, %v1014_v49 }
 0x53d   :  { %v1378_v40 = vpop.eup %1377  ;;  %1048 = vst [vmem:[#allocation7 + $0x38] sm:$0xff] %v1032_v33  ;;  %v1004_v1 = vmul.f32 0.6931472, %v1376_v38  ;;  %v988_v41 = vpop.xlane.xlu0 %987 }
 0x53e   :  { %1051 = vst [vmem:[#allocation7 + $0x50] sm:$0xff] %v1035_v39  ;;  %v1010_v52 = vmul.f32 0.6931472, %v1378_v40  ;;  %1387 = vlog2.f32 %v988_v41 }
 0x53f   :  { %v1030_v42 = vsub.f32 %v1900_v61, %v1004_v1 }
 0x540   :  { %v1380_v43 = vpop.eup %1379  ;;  %v1033_v46 = vsub.f32 %v1908_v12, %v1010_v52 }
 0x541   :  { %v1382_v47 = vpop.eup %1381  ;;  %1046 = vst [vmem:[#allocation7 + $0x28] sm:$0xff] %v1030_v42  ;;  %v1016_v11 = vmul.f32 0.6931472, %v1380_v43  ;;  %v992_v56 = vpop.xlane.xlu0 %991 }
 0x542   :  { %1049 = vst [vmem:[#allocation7 + $0x40] sm:$0xff] %v1033_v46  ;;  %v1018_v36 = vmul.f32 0.6931472, %v1382_v47  ;;  %1389 = vlog2.f32 %v992_v56 }
 0x543   :  { %v1036_v62 = vsub.f32 %v1911_v21, %v1016_v11 }
 0x544   :  { %v1384_v16 = vpop.eup %1383  ;;  %v1037_v28 = vsub.f32 %v1919_v31, %v1018_v36 }
 0x545   :  { %v1386_v44 = vpop.eup %1385  ;;  %1052 = vst [vmem:[#allocation7 + $0x58] sm:$0xff] %v1036_v62  ;;  %v1012_v48 = vmul.f32 0.6931472, %v1384_v16 }
 0x546   :  { %1053 = vst [vmem:[#allocation7 + $0x60] sm:$0xff] %v1037_v28  ;;  %v1022_v61 = vmul.f32 0.6931472, %v1386_v44 }
 0x547   :  { %v1034_v2 = vsub.f32 %v1916_v51, %v1012_v48 }
 0x548   :  { %v1388_v12 = vpop.eup %1387  ;;  %v1039_v4 = vsub.f32 %v1927_v37, %v1022_v61 }
 0x549   :  { %1050 = vst [vmem:[#allocation7 + $0x48] sm:$0xff] %v1034_v2  ;;  %v1020_v0 = vmul.f32 0.6931472, %v1388_v12 }
 0x54a   :  { %1055 = vst [vmem:[#allocation7 + $0x70] sm:$0xff] %v1039_v4 }
 0x54b   :  { %v1038_v5 = vsub.f32 %v1924_v35, %v1020_v0 }
 0x54c   :  { %v1390_v7 = vpop.eup %1389 }
 0x54d   :  { %1054 = vst [vmem:[#allocation7 + $0x68] sm:$0xff] %v1038_v5  ;;  %v1024_v21 = vmul.f32 0.6931472, %v1390_v7 }
 0x54f   :  { %v1040_v31 = vsub.f32 %v1932_v45, %v1024_v21 }
 0x551   :  { %1056 = vst [vmem:[#allocation7 + $0x78] sm:$0xff] %v1040_v31 }
 0x552   :  { %1446 = shalt.err (!%p1443_p6)
}
 0x553   :  { %s1447_s25 = scalar_lea.hbm %s1973_s7, 2048 }
 0x554   :  { %p1448_p7 = scmp.ne.s32.totalorder %s1973_s7, %s1447_s25  ;;  %p1451_p8 = scmp.lt.u32.totalorder %s1447_s25, %s1973_s7 }
 0x556   :  { %p1453_p9 = pnand %p1451_p8, %p1448_p7 }
 0x558   :  { %1456 = shalt.err (!%p1453_p9)
}
 0x559   :  { %1068 = dma.vmem_to_hbm [thread:$0]  %s1063_s22, 2048, %s1973_s7, [#allocation4], %s1464_s11, %s1464_s11, %s1465_s12  }
 0x55a   :  { %1461 = dma.done.wait [#allocation4], 2048  }
 0x55b   :  { %1462 = vsyncadd [#allocation4], 4294965248 }
 0x55c   :  { %1072 = vsyncpa [#allocation3], 1 }
 0x55d   :  { %1073 = vsyncpa [#allocation6], 1 }
 0x55e   :  { %1074 = vsyncpa [#allocation4], 1 }

</bundles_post_ra>
